<compile_context>
chip_gen: v5e
topology: v5e:2x2
jax: 0.10.0
libtpu: 0.0.40
codegen_flags: <defaults>
</compile_context>

<pallas_src>
import jax
import jax.numpy as jnp
from jax.experimental import pallas as pl
from jax.experimental.pallas import tpu as pltpu


def rnn_multilayer_kernel(
    x0_ref, v_ref,
    enc_w0_ref, enc_b0_ref, enc_w1_ref, enc_b1_ref,
    w_ih0_ref, w_hh0_ref, w_ih1_ref, w_hh1_ref,
    dec_w_ref, dec_b_ref,
    out_ref,
    pre0_scr, h1hist_scr,
):
    B = x0_ref.shape[0]
    T = v_ref.shape[0] // B

    x0 = x0_ref[...]          # (B, I)

    # Hoist loop-invariant weights into locals (loaded once, kept in vregs).
    w_hh0 = w_hh0_ref[...]    # (H, H)
    w_ih1 = w_ih1_ref[...]    # (H, H)
    w_hh1 = w_hh1_ref[...]    # (H, H)

    # Encoder -> initial hidden state per layer (B, H). Weights are pre-transposed.
    h0 = (
        jnp.dot(x0, enc_w0_ref[...], preferred_element_type=jnp.float32)
        + enc_b0_ref[...]
    )
    h1 = (
        jnp.dot(x0, enc_w1_ref[...], preferred_element_type=jnp.float32)
        + enc_b1_ref[...]
    )

    # Precompute the layer-0 input projection for all timesteps in one matmul:
    # (T*B, I) @ (I, H) -> (T*B, H), stored in VMEM scratch.
    pre0_scr[...] = jnp.dot(
        v_ref[...], w_ih0_ref[...], preferred_element_type=jnp.float32
    )

    # Serial recurrence, fully unrolled at trace time (T is small & static).
    # Hidden states stay in registers; only pre0 reads / h1-history writes touch VMEM,
    # and neither sits on the recurrent dependence chain.
    for t in range(T):
        pre0_t = pre0_scr[t * B:(t + 1) * B, :]                      # (B, H)
        h0 = jnp.maximum(
            pre0_t + jnp.dot(h0, w_hh0, preferred_element_type=jnp.float32),
            0.0,
        )
        # h1-term does not depend on h0 (new) -> overlaps with the layer-0 matmul.
        h1 = jnp.maximum(
            jnp.dot(h0, w_ih1, preferred_element_type=jnp.float32)
            + jnp.dot(h1, w_hh1, preferred_element_type=jnp.float32),
            0.0,
        )
        h1hist_scr[t * B:(t + 1) * B, :] = h1

    # Deferred decoder: one (T*B, H) @ (H, O) matmul + bias, single store.
    out_ref[...] = (
        jnp.dot(h1hist_scr[...], dec_w_ref[...], preferred_element_type=jnp.float32)
        + dec_b_ref[...]
    )


def rnn_multilayer_forward(x0, V, params):
    """x0: (B, I) float32;  V: (B, T, I) float32 (batch_first).  Returns (B, T, O)."""
    B, T, I = V.shape
    H = params["w_hh0"].shape[0]
    O = params["dec_w"].shape[0]

    # Time-major, flattened to (T*B, I) so each step is a contiguous row block.
    v_flat = jnp.transpose(V, (1, 0, 2)).reshape(T * B, I)

    vmem_spec = pl.BlockSpec(memory_space=pltpu.MemorySpace.VMEM)

    out_flat = pl.pallas_call(
        rnn_multilayer_kernel,
        out_shape=jax.ShapeDtypeStruct((T * B, O), jnp.float32),
        in_specs=[vmem_spec] * 12,
        out_specs=vmem_spec,
        scratch_shapes=[
            pltpu.VMEM((T * B, H), jnp.float32),  # precomputed layer-0 input projection
            pltpu.VMEM((T * B, H), jnp.float32),  # h1 history for the deferred decoder
        ],
    )(
        x0, v_flat,
        # All weights pre-transposed once in the wrapper (float32 preserved).
        params["enc_w0"].T, params["enc_b0"].reshape(1, H),
        params["enc_w1"].T, params["enc_b1"].reshape(1, H),
        params["w_ih0"].T, params["w_hh0"].T,
        params["w_ih1"].T, params["w_hh1"].T,
        params["dec_w"].T, params["dec_b"].reshape(1, O),
    )
    # (T*B, O) -> (B, T, O) batch_first.
    return jnp.transpose(out_flat.reshape(T, B, O), (1, 0, 2))


def init_params(key, hidden_size, input_size=2, output_size=2):
    """Deterministic init mimicking PyTorch defaults (uniform(-1/sqrt(fan_in), ...))."""
    H, I, O = hidden_size, input_size, output_size
    ks = jax.random.split(key, 10)

    def u(k, shape, fan_in):
        b = 1.0 / jnp.sqrt(fan_in)
        return jax.random.uniform(k, shape, jnp.float32, -b, b)

    return {
        # encoder Linears (input -> hidden), with bias
        "enc_w0": u(ks[0], (H, I), I), "enc_b0": u(ks[1], (H,), I),
        "enc_w1": u(ks[2], (H, I), I), "enc_b1": u(ks[3], (H,), I),
        # nn.RNN weights (bias=False), layer 0 then layer 1
        "w_ih0": u(ks[4], (H, I), H), "w_hh0": u(ks[5], (H, H), H),
        "w_ih1": u(ks[6], (H, H), H), "w_hh1": u(ks[7], (H, H), H),
        # decoder Linear (hidden -> output), with bias
        "dec_w": u(ks[8], (O, H), H), "dec_b": u(ks[9], (O,), H),
    }


def reference_forward(x0, V, params):
    """Pure-JAX reference matching PyTorch semantics."""
    h0 = x0 @ params["enc_w0"].T + params["enc_b0"]
    h1 = x0 @ params["enc_w1"].T + params["enc_b1"]
    outs = []
    for t in range(V.shape[1]):
        x_t = V[:, t, :]
        h0 = jax.nn.relu(x_t @ params["w_ih0"].T + h0 @ params["w_hh0"].T)
        h1 = jax.nn.relu(h0 @ params["w_ih1"].T + h1 @ params["w_hh1"].T)
        outs.append(h1 @ params["dec_w"].T + params["dec_b"])
    return jnp.stack(outs, axis=1)


if __name__ == "__main__":
    B, T, I, H, O = 2, 8, 2, 32, 2

    key = jax.random.PRNGKey(0)
    k_params, k_x0, k_v = jax.random.split(key, 3)

    params = init_params(k_params, hidden_size=H, input_size=I, output_size=O)
    x0 = jax.random.normal(k_x0, (B, I), jnp.float32)
    V = jax.random.normal(k_v, (B, T, I), jnp.float32)

    out = rnn_multilayer_forward(x0, V, params)
    out = jax.block_until_ready(out)

    ref = reference_forward(x0, V, params)
    assert out.shape == (B, T, O)
    assert jnp.allclose(out, ref, atol=1e-5, rtol=1e-4), "mismatch vs reference"

    print("KERNEL_OK")
</pallas_src>

<mosaic_0001>
module attributes {stable_mosaic.version = 11 : i64} {
  func.func @rnn_multilayer_kernel(%arg0: memref<2x2xf32, #tpu.memory_space<vmem>>, %arg1: memref<16x2xf32, #tpu.memory_space<vmem>>, %arg2: memref<2x32xf32, #tpu.memory_space<vmem>>, %arg3: memref<1x32xf32, #tpu.memory_space<vmem>>, %arg4: memref<2x32xf32, #tpu.memory_space<vmem>>, %arg5: memref<1x32xf32, #tpu.memory_space<vmem>>, %arg6: memref<2x32xf32, #tpu.memory_space<vmem>>, %arg7: memref<32x32xf32, #tpu.memory_space<vmem>>, %arg8: memref<32x32xf32, #tpu.memory_space<vmem>>, %arg9: memref<32x32xf32, #tpu.memory_space<vmem>>, %arg10: memref<32x2xf32, #tpu.memory_space<vmem>>, %arg11: memref<1x2xf32, #tpu.memory_space<vmem>>, %arg12: memref<16x2xf32, #tpu.memory_space<vmem>>, %arg13: memref<16x32xf32, #tpu.memory_space<vmem>>, %arg14: memref<16x32xf32, #tpu.memory_space<vmem>>) attributes {dimension_semantics = [], scalar_prefetch = 0 : i64, scratch_operands = 2 : i64, tpu.core_type = #tpu.core_type<tc>} {
    %c0 = arith.constant 0 : index
    %c0_0 = arith.constant 0 : index
    %0 = vector.load %arg0[%c0, %c0_0] : memref<2x2xf32, #tpu.memory_space<vmem>>, vector<2x2xf32>
    %c0_1 = arith.constant 0 : index
    %c0_2 = arith.constant 0 : index
    %1 = vector.load %arg7[%c0_1, %c0_2] : memref<32x32xf32, #tpu.memory_space<vmem>>, vector<32x32xf32>
    %c0_3 = arith.constant 0 : index
    %c0_4 = arith.constant 0 : index
    %2 = vector.load %arg8[%c0_3, %c0_4] : memref<32x32xf32, #tpu.memory_space<vmem>>, vector<32x32xf32>
    %c0_5 = arith.constant 0 : index
    %c0_6 = arith.constant 0 : index
    %3 = vector.load %arg9[%c0_5, %c0_6] : memref<32x32xf32, #tpu.memory_space<vmem>>, vector<32x32xf32>
    %c0_7 = arith.constant 0 : index
    %c0_8 = arith.constant 0 : index
    %4 = vector.load %arg2[%c0_7, %c0_8] : memref<2x32xf32, #tpu.memory_space<vmem>>, vector<2x32xf32>
    %cst = arith.constant dense<0.000000e+00> : vector<2x32xf32>
    %5 = tpu.matmul %0, %4, %cst {dimension_numbers = #tpu.dot_dimension_numbers<[1], [0], [0], [1], [0, 0, 1, 1], [], []>} : vector<2x2xf32>, vector<2x32xf32>, vector<2x32xf32> -> vector<2x32xf32>
    %c0_9 = arith.constant 0 : index
    %c0_10 = arith.constant 0 : index
    %6 = vector.load %arg3[%c0_9, %c0_10] : memref<1x32xf32, #tpu.memory_space<vmem>>, vector<1x32xf32>
    %7 = vector.broadcast %6 : vector<1x32xf32> to vector<2x32xf32>
    %8 = arith.addf %5, %7 : vector<2x32xf32>
    %c0_11 = arith.constant 0 : index
    %c0_12 = arith.constant 0 : index
    %9 = vector.load %arg4[%c0_11, %c0_12] : memref<2x32xf32, #tpu.memory_space<vmem>>, vector<2x32xf32>
    %cst_13 = arith.constant dense<0.000000e+00> : vector<2x32xf32>
    %10 = tpu.matmul %0, %9, %cst_13 {dimension_numbers = #tpu.dot_dimension_numbers<[1], [0], [0], [1], [0, 0, 1, 1], [], []>} : vector<2x2xf32>, vector<2x32xf32>, vector<2x32xf32> -> vector<2x32xf32>
    %c0_14 = arith.constant 0 : index
    %c0_15 = arith.constant 0 : index
    %11 = vector.load %arg5[%c0_14, %c0_15] : memref<1x32xf32, #tpu.memory_space<vmem>>, vector<1x32xf32>
    %12 = vector.broadcast %11 : vector<1x32xf32> to vector<2x32xf32>
    %13 = arith.addf %10, %12 : vector<2x32xf32>
    %c0_16 = arith.constant 0 : index
    %c0_17 = arith.constant 0 : index
    %14 = vector.load %arg1[%c0_16, %c0_17] : memref<16x2xf32, #tpu.memory_space<vmem>>, vector<16x2xf32>
    %c0_18 = arith.constant 0 : index
    %c0_19 = arith.constant 0 : index
    %15 = vector.load %arg6[%c0_18, %c0_19] : memref<2x32xf32, #tpu.memory_space<vmem>>, vector<2x32xf32>
    %cst_20 = arith.constant dense<0.000000e+00> : vector<16x32xf32>
    %16 = tpu.matmul %14, %15, %cst_20 {dimension_numbers = #tpu.dot_dimension_numbers<[1], [0], [0], [1], [0, 0, 1, 1], [], []>} : vector<16x2xf32>, vector<2x32xf32>, vector<16x32xf32> -> vector<16x32xf32>
    %c0_21 = arith.constant 0 : index
    %c0_22 = arith.constant 0 : index
    %17 = vector.load %arg13[%c0_21, %c0_22] : memref<16x32xf32, #tpu.memory_space<vmem>>, vector<16x32xf32>
    tpu.vector_store %arg13[%c0_21, %c0_22], %16 {strides = array<i32>} : memref<16x32xf32, #tpu.memory_space<vmem>>, vector<16x32xf32>,
    %c0_23 = arith.constant 0 : index
    %c0_24 = arith.constant 0 : index
    %18 = vector.load %arg13[%c0_23, %c0_24] : memref<16x32xf32, #tpu.memory_space<vmem>>, vector<2x32xf32>
    %cst_25 = arith.constant dense<0.000000e+00> : vector<2x32xf32>
    %19 = tpu.matmul %8, %1, %cst_25 {dimension_numbers = #tpu.dot_dimension_numbers<[1], [0], [0], [1], [0, 0, 1, 1], [], []>} : vector<2x32xf32>, vector<32x32xf32>, vector<2x32xf32> -> vector<2x32xf32>
    %20 = arith.addf %18, %19 : vector<2x32xf32>
    %cst_26 = arith.constant 0.000000e+00 : f32
    %21 = vector.broadcast %cst_26 : f32 to vector<2x32xf32>
    %22 = arith.maximumf %20, %21 : vector<2x32xf32>
    %cst_27 = arith.constant dense<0.000000e+00> : vector<2x32xf32>
    %23 = tpu.matmul %22, %2, %cst_27 {dimension_numbers = #tpu.dot_dimension_numbers<[1], [0], [0], [1], [0, 0, 1, 1], [], []>} : vector<2x32xf32>, vector<32x32xf32>, vector<2x32xf32> -> vector<2x32xf32>
    %cst_28 = arith.constant dense<0.000000e+00> : vector<2x32xf32>
    %24 = tpu.matmul %13, %3, %cst_28 {dimension_numbers = #tpu.dot_dimension_numbers<[1], [0], [0], [1], [0, 0, 1, 1], [], []>} : vector<2x32xf32>, vector<32x32xf32>, vector<2x32xf32> -> vector<2x32xf32>
    %25 = arith.addf %23, %24 : vector<2x32xf32>
    %cst_29 = arith.constant 0.000000e+00 : f32
    %26 = vector.broadcast %cst_29 : f32 to vector<2x32xf32>
    %27 = arith.maximumf %25, %26 : vector<2x32xf32>
    %c0_30 = arith.constant 0 : index
    %c0_31 = arith.constant 0 : index
    %28 = vector.load %arg14[%c0_30, %c0_31] : memref<16x32xf32, #tpu.memory_space<vmem>>, vector<2x32xf32>
    tpu.vector_store %arg14[%c0_30, %c0_31], %27 {strides = array<i32>} : memref<16x32xf32, #tpu.memory_space<vmem>>, vector<2x32xf32>,
    %c2 = arith.constant 2 : index
    %c0_32 = arith.constant 0 : index
    %29 = vector.load %arg13[%c2, %c0_32] : memref<16x32xf32, #tpu.memory_space<vmem>>, vector<2x32xf32>
    %cst_33 = arith.constant dense<0.000000e+00> : vector<2x32xf32>
    %30 = tpu.matmul %22, %1, %cst_33 {dimension_numbers = #tpu.dot_dimension_numbers<[1], [0], [0], [1], [0, 0, 1, 1], [], []>} : vector<2x32xf32>, vector<32x32xf32>, vector<2x32xf32> -> vector<2x32xf32>
    %31 = arith.addf %29, %30 : vector<2x32xf32>
    %cst_34 = arith.constant 0.000000e+00 : f32
    %32 = vector.broadcast %cst_34 : f32 to vector<2x32xf32>
    %33 = arith.maximumf %31, %32 : vector<2x32xf32>
    %cst_35 = arith.constant dense<0.000000e+00> : vector<2x32xf32>
    %34 = tpu.matmul %33, %2, %cst_35 {dimension_numbers = #tpu.dot_dimension_numbers<[1], [0], [0], [1], [0, 0, 1, 1], [], []>} : vector<2x32xf32>, vector<32x32xf32>, vector<2x32xf32> -> vector<2x32xf32>
    %cst_36 = arith.constant dense<0.000000e+00> : vector<2x32xf32>
    %35 = tpu.matmul %27, %3, %cst_36 {dimension_numbers = #tpu.dot_dimension_numbers<[1], [0], [0], [1], [0, 0, 1, 1], [], []>} : vector<2x32xf32>, vector<32x32xf32>, vector<2x32xf32> -> vector<2x32xf32>
    %36 = arith.addf %34, %35 : vector<2x32xf32>
    %cst_37 = arith.constant 0.000000e+00 : f32
    %37 = vector.broadcast %cst_37 : f32 to vector<2x32xf32>
    %38 = arith.maximumf %36, %37 : vector<2x32xf32>
    %c2_38 = arith.constant 2 : index
    %c0_39 = arith.constant 0 : index
    %39 = vector.load %arg14[%c2_38, %c0_39] : memref<16x32xf32, #tpu.memory_space<vmem>>, vector<2x32xf32>
    tpu.vector_store %arg14[%c2_38, %c0_39], %38 {strides = array<i32>} : memref<16x32xf32, #tpu.memory_space<vmem>>, vector<2x32xf32>,
    %c4 = arith.constant 4 : index
    %c0_40 = arith.constant 0 : index
    %40 = vector.load %arg13[%c4, %c0_40] : memref<16x32xf32, #tpu.memory_space<vmem>>, vector<2x32xf32>
    %cst_41 = arith.constant dense<0.000000e+00> : vector<2x32xf32>
    %41 = tpu.matmul %33, %1, %cst_41 {dimension_numbers = #tpu.dot_dimension_numbers<[1], [0], [0], [1], [0, 0, 1, 1], [], []>} : vector<2x32xf32>, vector<32x32xf32>, vector<2x32xf32> -> vector<2x32xf32>
    %42 = arith.addf %40, %41 : vector<2x32xf32>
    %cst_42 = arith.constant 0.000000e+00 : f32
    %43 = vector.broadcast %cst_42 : f32 to vector<2x32xf32>
    %44 = arith.maximumf %42, %43 : vector<2x32xf32>
    %cst_43 = arith.constant dense<0.000000e+00> : vector<2x32xf32>
    %45 = tpu.matmul %44, %2, %cst_43 {dimension_numbers = #tpu.dot_dimension_numbers<[1], [0], [0], [1], [0, 0, 1, 1], [], []>} : vector<2x32xf32>, vector<32x32xf32>, vector<2x32xf32> -> vector<2x32xf32>
    %cst_44 = arith.constant dense<0.000000e+00> : vector<2x32xf32>
    %46 = tpu.matmul %38, %3, %cst_44 {dimension_numbers = #tpu.dot_dimension_numbers<[1], [0], [0], [1], [0, 0, 1, 1], [], []>} : vector<2x32xf32>, vector<32x32xf32>, vector<2x32xf32> -> vector<2x32xf32>
    %47 = arith.addf %45, %46 : vector<2x32xf32>
    %cst_45 = arith.constant 0.000000e+00 : f32
    %48 = vector.broadcast %cst_45 : f32 to vector<2x32xf32>
    %49 = arith.maximumf %47, %48 : vector<2x32xf32>
    %c4_46 = arith.constant 4 : index
    %c0_47 = arith.constant 0 : index
    %50 = vector.load %arg14[%c4_46, %c0_47] : memref<16x32xf32, #tpu.memory_space<vmem>>, vector<2x32xf32>
    tpu.vector_store %arg14[%c4_46, %c0_47], %49 {strides = array<i32>} : memref<16x32xf32, #tpu.memory_space<vmem>>, vector<2x32xf32>,
    %c6 = arith.constant 6 : index
    %c0_48 = arith.constant 0 : index
    %51 = vector.load %arg13[%c6, %c0_48] : memref<16x32xf32, #tpu.memory_space<vmem>>, vector<2x32xf32>
    %cst_49 = arith.constant dense<0.000000e+00> : vector<2x32xf32>
    %52 = tpu.matmul %44, %1, %cst_49 {dimension_numbers = #tpu.dot_dimension_numbers<[1], [0], [0], [1], [0, 0, 1, 1], [], []>} : vector<2x32xf32>, vector<32x32xf32>, vector<2x32xf32> -> vector<2x32xf32>
    %53 = arith.addf %51, %52 : vector<2x32xf32>
    %cst_50 = arith.constant 0.000000e+00 : f32
    %54 = vector.broadcast %cst_50 : f32 to vector<2x32xf32>
    %55 = arith.maximumf %53, %54 : vector<2x32xf32>
    %cst_51 = arith.constant dense<0.000000e+00> : vector<2x32xf32>
    %56 = tpu.matmul %55, %2, %cst_51 {dimension_numbers = #tpu.dot_dimension_numbers<[1], [0], [0], [1], [0, 0, 1, 1], [], []>} : vector<2x32xf32>, vector<32x32xf32>, vector<2x32xf32> -> vector<2x32xf32>
    %cst_52 = arith.constant dense<0.000000e+00> : vector<2x32xf32>
    %57 = tpu.matmul %49, %3, %cst_52 {dimension_numbers = #tpu.dot_dimension_numbers<[1], [0], [0], [1], [0, 0, 1, 1], [], []>} : vector<2x32xf32>, vector<32x32xf32>, vector<2x32xf32> -> vector<2x32xf32>
    %58 = arith.addf %56, %57 : vector<2x32xf32>
    %cst_53 = arith.constant 0.000000e+00 : f32
    %59 = vector.broadcast %cst_53 : f32 to vector<2x32xf32>
    %60 = arith.maximumf %58, %59 : vector<2x32xf32>
    %c6_54 = arith.constant 6 : index
    %c0_55 = arith.constant 0 : index
    %61 = vector.load %arg14[%c6_54, %c0_55] : memref<16x32xf32, #tpu.memory_space<vmem>>, vector<2x32xf32>
    tpu.vector_store %arg14[%c6_54, %c0_55], %60 {strides = array<i32>} : memref<16x32xf32, #tpu.memory_space<vmem>>, vector<2x32xf32>,
    %c8 = arith.constant 8 : index
    %c0_56 = arith.constant 0 : index
    %62 = vector.load %arg13[%c8, %c0_56] : memref<16x32xf32, #tpu.memory_space<vmem>>, vector<2x32xf32>
    %cst_57 = arith.constant dense<0.000000e+00> : vector<2x32xf32>
    %63 = tpu.matmul %55, %1, %cst_57 {dimension_numbers = #tpu.dot_dimension_numbers<[1], [0], [0], [1], [0, 0, 1, 1], [], []>} : vector<2x32xf32>, vector<32x32xf32>, vector<2x32xf32> -> vector<2x32xf32>
    %64 = arith.addf %62, %63 : vector<2x32xf32>
    %cst_58 = arith.constant 0.000000e+00 : f32
    %65 = vector.broadcast %cst_58 : f32 to vector<2x32xf32>
    %66 = arith.maximumf %64, %65 : vector<2x32xf32>
    %cst_59 = arith.constant dense<0.000000e+00> : vector<2x32xf32>
    %67 = tpu.matmul %66, %2, %cst_59 {dimension_numbers = #tpu.dot_dimension_numbers<[1], [0], [0], [1], [0, 0, 1, 1], [], []>} : vector<2x32xf32>, vector<32x32xf32>, vector<2x32xf32> -> vector<2x32xf32>
    %cst_60 = arith.constant dense<0.000000e+00> : vector<2x32xf32>
    %68 = tpu.matmul %60, %3, %cst_60 {dimension_numbers = #tpu.dot_dimension_numbers<[1], [0], [0], [1], [0, 0, 1, 1], [], []>} : vector<2x32xf32>, vector<32x32xf32>, vector<2x32xf32> -> vector<2x32xf32>
    %69 = arith.addf %67, %68 : vector<2x32xf32>
    %cst_61 = arith.constant 0.000000e+00 : f32
    %70 = vector.broadcast %cst_61 : f32 to vector<2x32xf32>
    %71 = arith.maximumf %69, %70 : vector<2x32xf32>
    %c8_62 = arith.constant 8 : index
    %c0_63 = arith.constant 0 : index
    %72 = vector.load %arg14[%c8_62, %c0_63] : memref<16x32xf32, #tpu.memory_space<vmem>>, vector<2x32xf32>
    tpu.vector_store %arg14[%c8_62, %c0_63], %71 {strides = array<i32>} : memref<16x32xf32, #tpu.memory_space<vmem>>, vector<2x32xf32>,
    %c10 = arith.constant 10 : index
    %c0_64 = arith.constant 0 : index
    %73 = vector.load %arg13[%c10, %c0_64] : memref<16x32xf32, #tpu.memory_space<vmem>>, vector<2x32xf32>
    %cst_65 = arith.constant dense<0.000000e+00> : vector<2x32xf32>
    %74 = tpu.matmul %66, %1, %cst_65 {dimension_numbers = #tpu.dot_dimension_numbers<[1], [0], [0], [1], [0, 0, 1, 1], [], []>} : vector<2x32xf32>, vector<32x32xf32>, vector<2x32xf32> -> vector<2x32xf32>
    %75 = arith.addf %73, %74 : vector<2x32xf32>
    %cst_66 = arith.constant 0.000000e+00 : f32
    %76 = vector.broadcast %cst_66 : f32 to vector<2x32xf32>
    %77 = arith.maximumf %75, %76 : vector<2x32xf32>
    %cst_67 = arith.constant dense<0.000000e+00> : vector<2x32xf32>
    %78 = tpu.matmul %77, %2, %cst_67 {dimension_numbers = #tpu.dot_dimension_numbers<[1], [0], [0], [1], [0, 0, 1, 1], [], []>} : vector<2x32xf32>, vector<32x32xf32>, vector<2x32xf32> -> vector<2x32xf32>
    %cst_68 = arith.constant dense<0.000000e+00> : vector<2x32xf32>
    %79 = tpu.matmul %71, %3, %cst_68 {dimension_numbers = #tpu.dot_dimension_numbers<[1], [0], [0], [1], [0, 0, 1, 1], [], []>} : vector<2x32xf32>, vector<32x32xf32>, vector<2x32xf32> -> vector<2x32xf32>
    %80 = arith.addf %78, %79 : vector<2x32xf32>
    %cst_69 = arith.constant 0.000000e+00 : f32
    %81 = vector.broadcast %cst_69 : f32 to vector<2x32xf32>
    %82 = arith.maximumf %80, %81 : vector<2x32xf32>
    %c10_70 = arith.constant 10 : index
    %c0_71 = arith.constant 0 : index
    %83 = vector.load %arg14[%c10_70, %c0_71] : memref<16x32xf32, #tpu.memory_space<vmem>>, vector<2x32xf32>
    tpu.vector_store %arg14[%c10_70, %c0_71], %82 {strides = array<i32>} : memref<16x32xf32, #tpu.memory_space<vmem>>, vector<2x32xf32>,
    %c12 = arith.constant 12 : index
    %c0_72 = arith.constant 0 : index
    %84 = vector.load %arg13[%c12, %c0_72] : memref<16x32xf32, #tpu.memory_space<vmem>>, vector<2x32xf32>
    %cst_73 = arith.constant dense<0.000000e+00> : vector<2x32xf32>
    %85 = tpu.matmul %77, %1, %cst_73 {dimension_numbers = #tpu.dot_dimension_numbers<[1], [0], [0], [1], [0, 0, 1, 1], [], []>} : vector<2x32xf32>, vector<32x32xf32>, vector<2x32xf32> -> vector<2x32xf32>
    %86 = arith.addf %84, %85 : vector<2x32xf32>
    %cst_74 = arith.constant 0.000000e+00 : f32
    %87 = vector.broadcast %cst_74 : f32 to vector<2x32xf32>
    %88 = arith.maximumf %86, %87 : vector<2x32xf32>
    %cst_75 = arith.constant dense<0.000000e+00> : vector<2x32xf32>
    %89 = tpu.matmul %88, %2, %cst_75 {dimension_numbers = #tpu.dot_dimension_numbers<[1], [0], [0], [1], [0, 0, 1, 1], [], []>} : vector<2x32xf32>, vector<32x32xf32>, vector<2x32xf32> -> vector<2x32xf32>
    %cst_76 = arith.constant dense<0.000000e+00> : vector<2x32xf32>
    %90 = tpu.matmul %82, %3, %cst_76 {dimension_numbers = #tpu.dot_dimension_numbers<[1], [0], [0], [1], [0, 0, 1, 1], [], []>} : vector<2x32xf32>, vector<32x32xf32>, vector<2x32xf32> -> vector<2x32xf32>
    %91 = arith.addf %89, %90 : vector<2x32xf32>
    %cst_77 = arith.constant 0.000000e+00 : f32
    %92 = vector.broadcast %cst_77 : f32 to vector<2x32xf32>
    %93 = arith.maximumf %91, %92 : vector<2x32xf32>
    %c12_78 = arith.constant 12 : index
    %c0_79 = arith.constant 0 : index
    %94 = vector.load %arg14[%c12_78, %c0_79] : memref<16x32xf32, #tpu.memory_space<vmem>>, vector<2x32xf32>
    tpu.vector_store %arg14[%c12_78, %c0_79], %93 {strides = array<i32>} : memref<16x32xf32, #tpu.memory_space<vmem>>, vector<2x32xf32>,
    %c14 = arith.constant 14 : index
    %c0_80 = arith.constant 0 : index
    %95 = vector.load %arg13[%c14, %c0_80] : memref<16x32xf32, #tpu.memory_space<vmem>>, vector<2x32xf32>
    %cst_81 = arith.constant dense<0.000000e+00> : vector<2x32xf32>
    %96 = tpu.matmul %88, %1, %cst_81 {dimension_numbers = #tpu.dot_dimension_numbers<[1], [0], [0], [1], [0, 0, 1, 1], [], []>} : vector<2x32xf32>, vector<32x32xf32>, vector<2x32xf32> -> vector<2x32xf32>
    %97 = arith.addf %95, %96 : vector<2x32xf32>
    %cst_82 = arith.constant 0.000000e+00 : f32
    %98 = vector.broadcast %cst_82 : f32 to vector<2x32xf32>
    %99 = arith.maximumf %97, %98 : vector<2x32xf32>
    %cst_83 = arith.constant dense<0.000000e+00> : vector<2x32xf32>
    %100 = tpu.matmul %99, %2, %cst_83 {dimension_numbers = #tpu.dot_dimension_numbers<[1], [0], [0], [1], [0, 0, 1, 1], [], []>} : vector<2x32xf32>, vector<32x32xf32>, vector<2x32xf32> -> vector<2x32xf32>
    %cst_84 = arith.constant dense<0.000000e+00> : vector<2x32xf32>
    %101 = tpu.matmul %93, %3, %cst_84 {dimension_numbers = #tpu.dot_dimension_numbers<[1], [0], [0], [1], [0, 0, 1, 1], [], []>} : vector<2x32xf32>, vector<32x32xf32>, vector<2x32xf32> -> vector<2x32xf32>
    %102 = arith.addf %100, %101 : vector<2x32xf32>
    %cst_85 = arith.constant 0.000000e+00 : f32
    %103 = vector.broadcast %cst_85 : f32 to vector<2x32xf32>
    %104 = arith.maximumf %102, %103 : vector<2x32xf32>
    %c14_86 = arith.constant 14 : index
    %c0_87 = arith.constant 0 : index
    %105 = vector.load %arg14[%c14_86, %c0_87] : memref<16x32xf32, #tpu.memory_space<vmem>>, vector<2x32xf32>
    tpu.vector_store %arg14[%c14_86, %c0_87], %104 {strides = array<i32>} : memref<16x32xf32, #tpu.memory_space<vmem>>, vector<2x32xf32>,
    %c0_88 = arith.constant 0 : index
    %c0_89 = arith.constant 0 : index
    %106 = vector.load %arg14[%c0_88, %c0_89] : memref<16x32xf32, #tpu.memory_space<vmem>>, vector<16x32xf32>
    %c0_90 = arith.constant 0 : index
    %c0_91 = arith.constant 0 : index
    %107 = vector.load %arg10[%c0_90, %c0_91] : memref<32x2xf32, #tpu.memory_space<vmem>>, vector<32x2xf32>
    %cst_92 = arith.constant dense<0.000000e+00> : vector<16x2xf32>
    %108 = tpu.matmul %106, %107, %cst_92 {dimension_numbers = #tpu.dot_dimension_numbers<[1], [0], [0], [1], [0, 0, 1, 1], [], []>} : vector<16x32xf32>, vector<32x2xf32>, vector<16x2xf32> -> vector<16x2xf32>
    %c0_93 = arith.constant 0 : index
    %c0_94 = arith.constant 0 : index
    %109 = vector.load %arg11[%c0_93, %c0_94] : memref<1x2xf32, #tpu.memory_space<vmem>>, vector<1x2xf32>
    %110 = vector.broadcast %109 : vector<1x2xf32> to vector<16x2xf32>
    %111 = arith.addf %108, %110 : vector<16x2xf32>
    %c0_95 = arith.constant 0 : index
    %c0_96 = arith.constant 0 : index
    %112 = vector.load %arg12[%c0_95, %c0_96] : memref<16x2xf32, #tpu.memory_space<vmem>>, vector<16x2xf32>
    tpu.vector_store %arg12[%c0_95, %c0_96], %111 {strides = array<i32>} : memref<16x2xf32, #tpu.memory_space<vmem>>, vector<16x2xf32>,
    return
  }
}

</mosaic_0001>

<bundles_post_ra>
// kernel: tpu_custom_call.1
= control target key start
LH: loop header
LB: loop body
LE: loop exit
PB: predicated region body
PF: predicated region fallthrough
CT: control target
= control target key end

     0   :  { %17 = vsyncpa [#allocation5], 0  ;;  %s1193_s0 = inlined_call_operand.vmem [shape: f32[2,2], index: 0, kind: input, shape index: {}]   ;;  %s1194_s1 = inlined_call_operand.vmem [shape: f32[16,2], index: 1, kind: input, shape index: {}]   ;;  %s1195_s2 = inlined_call_operand.vmem [shape: f32[2,32], index: 2, kind: input, shape index: {}]   ;;  %s1196_s3 = inlined_call_operand.vmem [shape: f32[1,32], index: 3, kind: input, shape index: {}]   ;;  %s1197_s4 = inlined_call_operand.vmem [shape: f32[2,32], index: 4, kind: input, shape index: {}]   ;;  %s1198_s5 = inlined_call_operand.vmem [shape: f32[1,32], index: 5, kind: input, shape index: {}]   ;;  %s1199_s6 = inlined_call_operand.vmem [shape: f32[2,32], index: 6, kind: input, shape index: {}]   ;;  %s1200_s7 = inlined_call_operand.vmem [shape: f32[32,32], index: 7, kind: input, shape index: {}]   ;;  %s1201_s8 = inlined_call_operand.hbm [shape: f32[32,32], index: 8, kind: input, shape index: {}]   ;;  %s1202_s9 = inlined_call_operand.hbm [shape: f32[32,32], index: 9, kind: input, shape index: {}]   ;;  %s1203_s10 = inlined_call_operand.vmem [shape: f32[32,2], index: 10, kind: input, shape index: {}]   ;;  %s1204_s11 = inlined_call_operand.vmem [shape: f32[1,2], index: 11, kind: input, shape index: {}]   ;;  %s1205_s12 = inlined_call_operand.vmem [shape: f32[16,2], index: 12, kind: output, shape index: {}]  }
   0x1   :  { %s39_s23 = sshll.u32 %s1201_s8, 4  ;;  %s40_s23 = int_to_ptr.hbm [resolvable:$true] %s39_s23 }
   0x2   :  { %18 = vsyncpa [#allocation7], 0  ;;  %s896_s24 = smov [#allocation4]   ;;  %s52_s28 = sshll.u32 %s1202_s9, 4  ;;  %s53_s28 = int_to_ptr.hbm [resolvable:$true] %s52_s28 }
   0x3   :  { %s41_s25 = sshll.u32 %s896_s24, 4  ;;  %s897_s29 = smov 128   ;;  %s42_s25 = int_to_ptr.vmem [resolvable:$true] %s41_s25 }
   0x4   :  { %s898_s30 = smov 8   ;;  %s899_s13 = smov [#allocation6]  }
   0x5   :  { %47 = dma.hbm_to_vmem [thread:$0]  %s40_s23, 512, %s42_s25, [#allocation5], %s897_s29, %s897_s29, %s898_s30  }
   0x6   :  { %s54_s14 = sshll.u32 %s899_s13, 4  ;;  %s55_s14 = int_to_ptr.vmem [resolvable:$true] %s54_s14 }
   0x7   :  { %60 = dma.hbm_to_vmem [thread:$0]  %s53_s28, 512, %s55_s14, [#allocation7], %s897_s29, %s897_s29, %s898_s30  }
   0x8   :  { %892 = dma.done.wait [#allocation5], 512  }
   0x9   :  { %893 = vsyncadd [#allocation5], 4294966784 }
   0xa   :  { %894 = dma.done.wait [#allocation7], 512  }
   0xb   :  { %895 = vsyncadd [#allocation7], 4294966784  ;;  %vm95_vm0 = vcmask 1041408   ;;  %vm91_vm1 = vcmask 15360   ;;  %v86_v0 = vld [vmem:[%s1195_s2] sm:$0x3] }
   0xc   :  { %v73_v1 = vld [vmem:[%s1193_s0] sm:$0x3]  ;;  %804 = vmatpush.msk.msra.mxu0 %vm95_vm0, %v86_v0  ;;  %v988_v4 = vld [vmem:[%s1200_s7 + $0x18] sm:$0xff]  ;;  %v995_v5 = vld [vmem:[%s1200_s7 + $0x10] sm:$0xff]  ;;  %vm182_vm2 = vcmask 261120   ;;  %vm258_vm3 = vcmask 254976  }
   0xd   :  { %v149_v2 = vld [vmem:[%s1199_s6] sm:$0x3]  ;;  %805 = vmatmul.msk.f32.vlgmr.msra.gmra.mxu0 %vm91_vm1, %v73_v1  ;;  %201 = vmatpush.msra.mxu3 %v988_v4  ;;  %v1004_v6 = vld [vmem:[%s1200_s7 + $0x8] sm:$0xff]  ;;  %v1019_v9 = vld [vmem:[#allocation6 + $0x18] sm:$0xff] }
   0xe   :  { %808 = vmatpush.msk.msra.mxu2 %vm95_vm0, %v149_v2  ;;  %v147_v3 = vld [vmem:[%s1194_s1] sm:$0xff]  ;;  %298 = vmatpush.msrb.mxu0 %v1019_v9  ;;  %v1027_v10 = vld [vmem:[#allocation6 + $0x10] sm:$0xff]  ;;  %v1041_v15 = vld [vmem:[#allocation6 + $0x8] sm:$0xff] }
   0xf   :  { %809 = vmatmul.msk.f32.vlgmr.msra.gmra.mxu2 %vm91_vm1, %v147_v3  ;;  %202 = vmatpush.msra.mxu3 %v995_v5  ;;  %v119_v7 = vld [vmem:[%s1197_s4] sm:$0x3]  ;;  %v1047_v17 = vld [vmem:[#allocation4 + $0x18] sm:$0xff]  ;;  %v1061_v21 = vld [vmem:[#allocation4 + $0x10] sm:$0xff] }
  0x10   :  { %344 = vmatpush.msrb.mxu2 %v988_v4  ;;  %v1014_v8 = vld [vmem:[%s1200_s7] sm:$0xff]  ;;  %806 = vmatpush.msk.msra.mxu1 %vm95_vm0, %v119_v7  ;;  %v1065_v22 = vld [vmem:[#allocation4 + $0x8] sm:$0xff] }
  0x11   :  { %203 = vmatpush.msra.mxu3 %v1004_v6  ;;  %807 = vmatmul.msk.f32.vlgmr.msra.gmra.mxu1 %vm91_vm1, %v73_v1  ;;  %v841_v11 = vld [vmem:[%s1196_s3] ss:$0 sm:$0xff]  ;;  %v148_v28 = vld [vmem:[%s1194_s1 + $0x8] sm:$0xff] }
  0x12   :  { %345 = vmatpush.msrb.mxu2 %v995_v5  ;;  %226 = vmatpush.msrb.mxu1 %v1019_v9  ;;  %v1043_v16 = vld [vmem:[#allocation6] sm:$0xff] }
  0x13   :  { %204 = vmatpush.msra.mxu3 %v1014_v8  ;;  %299 = vmatpush.msrb.mxu0 %v1027_v10  ;;  %v842_v18 = vld [vmem:[%s1198_s5] ss:$0 sm:$0xff] }
  0x14   :  { %346 = vmatpush.msrb.mxu2 %v1004_v6  ;;  %227 = vmatpush.msrb.mxu1 %v1027_v10  ;;  %v1069_v23 = vld [vmem:[#allocation4] sm:$0xff] }
  0x15   :  { %273 = vmatpush.msrb.mxu3 %v988_v4  ;;  %300 = vmatpush.msrb.mxu0 %v1041_v15 }
  0x16   :  { %347 = vmatpush.msrb.mxu2 %v1014_v8  ;;  %228 = vmatpush.msrb.mxu1 %v1041_v15 }
  0x17   :  { %274 = vmatpush.msrb.mxu3 %v995_v5  ;;  %301 = vmatpush.msrb.mxu0 %v1043_v16 }
  0x18   :  { %440 = vmatpush.msra.mxu2 %v1019_v9  ;;  %229 = vmatpush.msrb.mxu1 %v1043_v16 }
  0x19   :  { %275 = vmatpush.msrb.mxu3 %v1004_v6  ;;  %392 = vmatpush.msra.mxu0 %v1047_v17 }
  0x1a   :  { %441 = vmatpush.msra.mxu2 %v1027_v10  ;;  %249 = vmatpush.msra.mxu1 %v1047_v17 }
  0x1b   :  { %276 = vmatpush.msrb.mxu3 %v1014_v8  ;;  %393 = vmatpush.msra.mxu0 %v1061_v21 }
  0x1c   :  { %442 = vmatpush.msra.mxu2 %v1041_v15  ;;  %250 = vmatpush.msra.mxu1 %v1061_v21 }
  0x1d   :  { %394 = vmatpush.msra.mxu0 %v1065_v22  ;;  %810 = vmatmul.msk.f32.gmra.mxu2 %vm91_vm1, %v148_v28 }
  0x1e   :  { %443 = vmatpush.msra.mxu2 %v1043_v16  ;;  %251 = vmatpush.msra.mxu1 %v1065_v22 }
  0x1f   :  { %395 = vmatpush.msra.mxu0 %v1069_v23 }
  0x20   :  { %252 = vmatpush.msra.mxu1 %v1069_v23 }
  0x8a   :  { %v116_v12 = vpop.f32.mrf.mxu0 }
  0x8b   :  { %v117_v13 = vadd.f32 %v841_v11, %v116_v12 }
  0x8d   :  { %811 = vmatmul.msk.f32.vlgmr.msra.gmra.mxu3 %vm182_vm2, %v117_v13 }
  0x8e   :  { %369 = vmatpush.msra.mxu3 %v1019_v9  ;;  %v144_v19 = vpop.f32.mrf.mxu1 }
  0x8f   :  { %v145_v20 = vadd.f32 %v842_v18, %v144_v19 }
  0x90   :  { %370 = vmatpush.msra.mxu3 %v1027_v10 }
  0x91   :  { %812 = vmatmul.msk.f32.vlgmr.msrb.gmra.mxu1 %vm182_vm2, %v145_v20 }
  0x92   :  { %v176_v14 = vpop.f32.mrf.mxu2  ;;  %371 = vmatpush.msra.mxu3 %v1041_v15  ;;  %321 = vmatpush.msrb.mxu1 %v1047_v17 }
  0x93   :  { %183 = vst.msk [vmem:[#allocation2] sm:$0xff] %vm182_vm2, %v176_v14 }
  0x94   :  { %372 = vmatpush.msra.mxu3 %v1043_v16  ;;  %322 = vmatpush.msrb.mxu1 %v1061_v21 }
  0x96   :  { %323 = vmatpush.msrb.mxu1 %v1065_v22 }
  0x98   :  { %324 = vmatpush.msrb.mxu1 %v1069_v23 }
  0x9a   :  { %v185_v24 = vld [vmem:[#allocation2] sm:$0x3]  ;;  %v260_v33 = vld [vmem:[#allocation2 + $0x2] sm:$0x3]  ;;  %v331_v42 = vld [vmem:[#allocation2 + $0x4] sm:$0x3] }
  0x9b   :  { %v402_v49 = vld [vmem:[#allocation2 + $0x6] sm:$0x3] }
  0xa0   :  { %v179_v37 = vpop.f32.mrf.mxu2 }
  0xa1   :  { %184 = vst.msk [vmem:[#allocation2 + $0x8] sm:$0xff] %vm182_vm2, %v179_v37 }
  0xa8   :  { %v473_v54 = vld [vmem:[#allocation2 + $0x8] sm:$0x3]  ;;  %v544_v1 = vld [vmem:[#allocation2 + $0xa] sm:$0x3]  ;;  %v615_v14 = vld [vmem:[#allocation2 + $0xc] sm:$0x3] }
 0x10e   :  { %v231_v29 = vpop.f32.mrf.mxu1 }
 0x110   :  { %v206_v25 = vpop.f32.mrf.mxu3 }
 0x111   :  { %v209_v26 = vadd.f32 %v206_v25, %v185_v24 }
 0x113   :  { %v210_v27 = vmax.f32 %v209_v26, 0.0 }
 0x115   :  { %813 = vmatmul.msk.f32.vlgmr.msra.gmra.mxu1 %vm182_vm2, %v210_v27  ;;  %814 = vmatmul.msk.f32.vlgmr.msrb.gmra.mxu3 %vm182_vm2, %v210_v27  ;;  %v843_v27 = vld [vmem:[%s1204_s11] ss:$0 sm:$0xff] }
 0x116   :  { %415 = vmatpush.msra.mxu1 %v988_v4  ;;  %463 = vmatpush.msrb.mxu3 %v1047_v17 }
 0x118   :  { %416 = vmatpush.msra.mxu1 %v995_v5  ;;  %464 = vmatpush.msrb.mxu3 %v1061_v21 }
 0x11a   :  { %417 = vmatpush.msra.mxu1 %v1004_v6  ;;  %465 = vmatpush.msrb.mxu3 %v1065_v22 }
 0x11c   :  { %418 = vmatpush.msra.mxu1 %v1014_v8  ;;  %466 = vmatpush.msrb.mxu3 %v1069_v23 }
 0x192   :  { %v254_v30 = vpop.f32.mrf.mxu1 }
 0x193   :  { %v255_v31 = vadd.f32 %v254_v30, %v231_v29 }
 0x195   :  { %v257_v32 = vmax.f32 %v255_v31, 0.0 }
 0x197   :  { %259 = vst.msk [vmem:[#allocation3] sm:$0x3] %vm258_vm3, %v257_v32  ;;  %815 = vmatmul.msk.f32.vlgmr.msrb.gmra.mxu0 %vm182_vm2, %v257_v32 }
 0x198   :  { %v278_v34 = vpop.f32.mrf.mxu3  ;;  %486 = vmatpush.msrb.mxu0 %v988_v4 }
 0x199   :  { %v281_v35 = vadd.f32 %v278_v34, %v260_v33 }
 0x19a   :  { %487 = vmatpush.msrb.mxu0 %v995_v5 }
 0x19b   :  { %v282_v36 = vmax.f32 %v281_v35, 0.0 }
 0x19c   :  { %488 = vmatpush.msrb.mxu0 %v1004_v6 }
 0x19d   :  { %816 = vmatmul.msk.f32.vlgmr.msrb.gmra.mxu1 %vm182_vm2, %v282_v36  ;;  %817 = vmatmul.msk.f32.vlgmr.msrb.gmra.mxu2 %vm182_vm2, %v282_v36 }
 0x19e   :  { %489 = vmatpush.msrb.mxu0 %v1014_v8  ;;  %534 = vmatpush.msrb.mxu2 %v1047_v17 }
 0x19f   :  { %511 = vmatpush.msrb.mxu1 %v1019_v9 }
 0x1a0   :  { %535 = vmatpush.msrb.mxu2 %v1061_v21 }
 0x1a1   :  { %512 = vmatpush.msrb.mxu1 %v1027_v10 }
 0x1a2   :  { %536 = vmatpush.msrb.mxu2 %v1065_v22 }
 0x1a3   :  { %513 = vmatpush.msrb.mxu1 %v1041_v15 }
 0x1a4   :  { %537 = vmatpush.msrb.mxu2 %v1069_v23 }
 0x1a5   :  { %514 = vmatpush.msrb.mxu1 %v1043_v16 }
 0x214   :  { %v303_v38 = vpop.f32.mrf.mxu0 }
 0x21a   :  { %v326_v39 = vpop.f32.mrf.mxu1 }
 0x21b   :  { %v327_v40 = vadd.f32 %v326_v39, %v303_v38 }
 0x21d   :  { %v329_v41 = vmax.f32 %v327_v40, 0.0 }
 0x21f   :  { %330 = vst.msk [vmem:[#allocation3 + $0x2] sm:$0x3] %vm258_vm3, %v329_v41  ;;  %818 = vmatmul.msk.f32.vlgmr.msra.gmra.mxu3 %vm182_vm2, %v329_v41 }
 0x220   :  { %v349_v43 = vpop.f32.mrf.mxu2  ;;  %557 = vmatpush.msra.mxu3 %v988_v4 }
 0x221   :  { %v352_v44 = vadd.f32 %v349_v43, %v331_v42 }
 0x222   :  { %558 = vmatpush.msra.mxu3 %v995_v5 }
 0x223   :  { %v353_v45 = vmax.f32 %v352_v44, 0.0 }
 0x224   :  { %559 = vmatpush.msra.mxu3 %v1004_v6 }
 0x225   :  { %819 = vmatmul.msk.f32.vlgmr.msra.gmra.mxu0 %vm182_vm2, %v353_v45  ;;  %820 = vmatmul.msk.f32.vlgmr.msra.gmra.mxu1 %vm182_vm2, %v353_v45 }
 0x226   :  { %560 = vmatpush.msra.mxu3 %v1014_v8  ;;  %582 = vmatpush.msra.mxu0 %v1019_v9 }
 0x227   :  { %605 = vmatpush.msra.mxu1 %v1047_v17 }
 0x228   :  { %583 = vmatpush.msra.mxu0 %v1027_v10 }
 0x229   :  { %606 = vmatpush.msra.mxu1 %v1061_v21 }
 0x22a   :  { %584 = vmatpush.msra.mxu0 %v1041_v15 }
 0x22b   :  { %607 = vmatpush.msra.mxu1 %v1065_v22 }
 0x22c   :  { %585 = vmatpush.msra.mxu0 %v1043_v16 }
 0x22d   :  { %608 = vmatpush.msra.mxu1 %v1069_v23 }
 0x2a2   :  { %v374_v46 = vpop.f32.mrf.mxu3  ;;  %v397_v47 = vpop.f32.mrf.mxu0 }
 0x2a3   :  { %v398_v48 = vadd.f32 %v397_v47, %v374_v46  ;;  %v420_v50 = vpop.f32.mrf.mxu1 }
 0x2a4   :  { %v423_v51 = vadd.f32 %v420_v50, %v402_v49 }
 0x2a5   :  { %v400_v52 = vmax.f32 %v398_v48, 0.0 }
 0x2a6   :  { %v424_v53 = vmax.f32 %v423_v51, 0.0 }
 0x2a7   :  { %401 = vst.msk [vmem:[#allocation3 + $0x4] sm:$0x3] %vm258_vm3, %v400_v52  ;;  %821 = vmatmul.msk.f32.vlgmr.msra.gmra.mxu2 %vm182_vm2, %v400_v52 }
 0x2a8   :  { %822 = vmatmul.msk.f32.vlgmr.msrb.gmra.mxu3 %vm182_vm2, %v424_v53  ;;  %823 = vmatmul.msk.f32.vlgmr.msrb.gmra.mxu0 %vm182_vm2, %v424_v53 }
 0x2a9   :  { %628 = vmatpush.msra.mxu2 %v988_v4  ;;  %653 = vmatpush.msrb.mxu3 %v1019_v9 }
 0x2aa   :  { %676 = vmatpush.msrb.mxu0 %v1047_v17 }
 0x2ab   :  { %629 = vmatpush.msra.mxu2 %v995_v5  ;;  %654 = vmatpush.msrb.mxu3 %v1027_v10 }
 0x2ac   :  { %677 = vmatpush.msrb.mxu0 %v1061_v21 }
 0x2ad   :  { %630 = vmatpush.msra.mxu2 %v1004_v6  ;;  %655 = vmatpush.msrb.mxu3 %v1041_v15 }
 0x2ae   :  { %678 = vmatpush.msrb.mxu0 %v1065_v22 }
 0x2af   :  { %631 = vmatpush.msra.mxu2 %v1014_v8  ;;  %656 = vmatpush.msrb.mxu3 %v1043_v16 }
 0x2b0   :  { %679 = vmatpush.msrb.mxu0 %v1069_v23 }
 0x325   :  { %v491_v55 = vpop.f32.mrf.mxu0 }
 0x326   :  { %v494_v56 = vadd.f32 %v491_v55, %v473_v54 }
 0x328   :  { %v495_v57 = vmax.f32 %v494_v56, 0.0 }
 0x32a   :  { %825 = vmatmul.msk.f32.vlgmr.msrb.gmra.mxu2 %vm182_vm2, %v495_v57  ;;  %826 = vmatmul.msk.f32.vlgmr.msra.gmra.mxu3 %vm182_vm2, %v495_v57  ;;  %v445_v58 = vpop.f32.mrf.mxu2 }
 0x32b   :  { %v468_v59 = vpop.f32.mrf.mxu3  ;;  %724 = vmatpush.msrb.mxu2 %v1019_v9  ;;  %747 = vmatpush.msra.mxu3 %v1047_v17 }
 0x32c   :  { %v469_v60 = vadd.f32 %v468_v59, %v445_v58 }
 0x32d   :  { %725 = vmatpush.msrb.mxu2 %v1027_v10  ;;  %748 = vmatpush.msra.mxu3 %v1061_v21 }
 0x32e   :  { %v471_v61 = vmax.f32 %v469_v60, 0.0 }
 0x32f   :  { %726 = vmatpush.msrb.mxu2 %v1041_v15  ;;  %749 = vmatpush.msra.mxu3 %v1065_v22  ;;  %v686_v22 = vld [vmem:[#allocation2 + $0xe] sm:$0x3] }
 0x330   :  { %472 = vst.msk [vmem:[#allocation3 + $0x6] sm:$0x3] %vm258_vm3, %v471_v61  ;;  %824 = vmatmul.msk.f32.vlgmr.msrb.gmra.mxu1 %vm182_vm2, %v471_v61 }
 0x331   :  { %699 = vmatpush.msrb.mxu1 %v988_v4  ;;  %727 = vmatpush.msrb.mxu2 %v1043_v16  ;;  %v762_v4 = vld [vmem:[%s1203_s10 + $0x18] sm:$0xff] }
 0x332   :  { %750 = vmatpush.msra.mxu3 %v1069_v23 }
 0x333   :  { %700 = vmatpush.msrb.mxu1 %v995_v5  ;;  %v761_v5 = vld [vmem:[%s1203_s10 + $0x10] sm:$0xff] }
 0x335   :  { %701 = vmatpush.msrb.mxu1 %v1004_v6  ;;  %v760_v6 = vld [vmem:[%s1203_s10 + $0x8] sm:$0xff] }
 0x337   :  { %702 = vmatpush.msrb.mxu1 %v1014_v8  ;;  %v759_v8 = vld [vmem:[%s1203_s10] sm:$0xff]  ;;  %v757_v18 = vld [vmem:[#allocation3] sm:$0xff] }
 0x3ad   :  { %v516_v62 = vpop.f32.mrf.mxu1  ;;  %v539_v63 = vpop.f32.mrf.mxu2 }
 0x3ae   :  { %v540_v0 = vadd.f32 %v539_v63, %v516_v62  ;;  %v562_v2 = vpop.f32.mrf.mxu3 }
 0x3af   :  { %v565_v3 = vadd.f32 %v562_v2, %v544_v1 }
 0x3b0   :  { %v542_v7 = vmax.f32 %v540_v0, 0.0 }
 0x3b1   :  { %v566_v9 = vmax.f32 %v565_v3, 0.0 }
 0x3b2   :  { %543 = vst.msk [vmem:[#allocation3 + $0x8] sm:$0x3] %vm258_vm3, %v542_v7  ;;  %827 = vmatmul.msk.f32.vlgmr.msra.gmra.mxu0 %vm182_vm2, %v542_v7 }
 0x3b3   :  { %828 = vmatmul.msk.f32.vlgmr.msra.gmra.mxu1 %vm182_vm2, %v566_v9  ;;  %829 = vmatmul.msk.f32.vlgmr.msra.gmra.mxu2 %vm182_vm2, %v566_v9 }
 0x3b4   :  { %785 = vmatpush.msra.mxu0 %v762_v4 }
 0x3b6   :  { %786 = vmatpush.msra.mxu0 %v761_v5 }
 0x3b8   :  { %787 = vmatpush.msra.mxu0 %v760_v6 }
 0x3ba   :  { %788 = vmatpush.msra.mxu0 %v759_v8 }
 0x42f   :  { %v587_v10 = vpop.f32.mrf.mxu0 }
 0x430   :  { %v610_v11 = vpop.f32.mrf.mxu1 }
 0x431   :  { %v611_v12 = vadd.f32 %v610_v11, %v587_v10 }
 0x433   :  { %v613_v13 = vmax.f32 %v611_v12, 0.0 }
 0x435   :  { %614 = vst.msk [vmem:[#allocation3 + $0xa] sm:$0x3] %vm258_vm3, %v613_v13  ;;  %830 = vmatmul.msk.f32.vlgmr.msrb.gmra.mxu3 %vm182_vm2, %v613_v13 }
 0x436   :  { %v633_v15 = vpop.f32.mrf.mxu2 }
 0x437   :  { %v636_v16 = vadd.f32 %v633_v15, %v615_v14 }
 0x439   :  { %v637_v17 = vmax.f32 %v636_v16, 0.0 }
 0x43b   :  { %831 = vmatmul.msk.f32.vlgmr.msrb.gmra.mxu0 %vm182_vm2, %v637_v17  ;;  %832 = vmatmul.msk.f32.vlgmr.msrb.gmra.mxu1 %vm182_vm2, %v637_v17 }
 0x443   :  { %835 = vmatmul.msk.f32.vlgmr.msra.gmra.mxu0 %vm182_vm2, %v757_v18 }
 0x4b8   :  { %v658_v19 = vpop.f32.mrf.mxu3  ;;  %v681_v20 = vpop.f32.mrf.mxu0 }
 0x4b9   :  { %v682_v21 = vadd.f32 %v681_v20, %v658_v19  ;;  %v704_v23 = vpop.f32.mrf.mxu1 }
 0x4ba   :  { %v707_v24 = vadd.f32 %v704_v23, %v686_v22 }
 0x4bb   :  { %v684_v25 = vmax.f32 %v682_v21, 0.0 }
 0x4bc   :  { %v708_v26 = vmax.f32 %v707_v24, 0.0 }
 0x4bd   :  { %685 = vst.msk [vmem:[#allocation3 + $0xc] sm:$0x3] %vm258_vm3, %v684_v25  ;;  %833 = vmatmul.msk.f32.vlgmr.msrb.gmra.mxu2 %vm182_vm2, %v684_v25 }
 0x4be   :  { %834 = vmatmul.msk.f32.vlgmr.msra.gmra.mxu3 %vm182_vm2, %v708_v26 }
 0x4c0   :  { %v790_v28 = vpop.f32.mrf.mxu0 }
 0x4c1   :  { %v791_v29 = vadd.f32 %v843_v27, %v790_v28 }
 0x4c3   :  { %796 = vst.msk [vmem:[%s1205_s12] sm:$0xff] %vm91_vm1, %v791_v29 }
 0x540   :  { %v729_v30 = vpop.f32.mrf.mxu2 }
 0x541   :  { %v752_v31 = vpop.f32.mrf.mxu3 }
 0x542   :  { %v753_v32 = vadd.f32 %v752_v31, %v729_v30 }
 0x544   :  { %v755_v33 = vmax.f32 %v753_v32, 0.0 }
 0x546   :  { %756 = vst.msk [vmem:[#allocation3 + $0xe] sm:$0x3] %vm258_vm3, %v755_v33 }
 0x54d   :  { %v758_v34 = vld [vmem:[#allocation3 + $0x8] sm:$0xff] }
 0x54e   :  { %836 = vmatmul.msk.f32.gmra.mxu0 %vm182_vm2, %v758_v34 }
 0x5cb   :  { %v793_v35 = vpop.f32.mrf.mxu0 }
 0x5cc   :  { %v794_v36 = vadd.f32 %v843_v27, %v793_v35 }
 0x5ce   :  { %797 = vst.msk [vmem:[%s1205_s12 + $0x8] sm:$0xff] %vm91_vm1, %v794_v36 }
 0x5cf   :  { %802 = vsyncpa [#allocation5], 1 }
 0x5d0   :  { %803 = vsyncpa [#allocation7], 1 }

</bundles_post_ra>
